<compile_context>
chip_gen: v5e
topology: v5e:2x2
jax: 0.10.0
libtpu: 0.0.40
codegen_flags: <defaults>
</compile_context>

<pallas_src>
import math

import jax
import jax.numpy as jnp
from jax.experimental import pallas as pl
from jax.experimental.pallas import tpu as pltpu


# ------------------------------ Pallas kernel ------------------------------
def _pos_enc_kernel(x_ref, pe_ref, o_ref):
    # x_ref/o_ref : (TILE_S, B, D)   pe_ref : (TILE_S, D)
    # Add in the promoted dtype (bf16 x + f32 pe -> f32 add on v5e's f32-only
    # VPU; pure f32 here), store in the output dtype.  The VPU has huge slack
    # in a mem-bound kernel, so the broadcast/cast are free under the DMA.
    o_ref[...] = (x_ref[...] + pe_ref[...][:, None, :]).astype(o_ref.dtype)
    # TODO(synk): nn.Dropout(p=0.1) is identity in eval mode; a training-mode
    # variant would draw the mask in-kernel with pltpu.prng_seed /
    # pltpu.stateful_bernoulli.


# ------------------------------ tile sizing ---------------------------------
def _choose_tile_s(S, B, D, itemsize, target_block_bytes=4 << 20):
    """TILE_S: multiple of 8, sized so one (TILE_S, B, D) block is ~4 MiB.

    With 2x double-buffered input + output + pe blocks this stays under
    ~20 MiB of VMEM, which fits every generation (v5e/v6e/v7x) once the
    scoped limit is raised via vmem_limit_bytes.
    """
    bytes_per_row = max(1, B * D * itemsize)
    rows = max(8, (target_block_bytes // bytes_per_row) // 8 * 8)
    s_padded = -(-S // 8) * 8          # round S up to a multiple of 8
    return int(min(rows, s_padded))


# -------------------------------- wrapper ----------------------------------
def positional_encoding_forward(x, pe, *, tile_s=None):
    """x: (seq_len, batch, d_model); pe: (max_len, 1, d_model) or (max_len, d_model)."""
    S, B, D = x.shape
    if pe.ndim == 3:                    # matches the registered (max_len, 1, d_model) buffer
        pe = pe.reshape(pe.shape[0], pe.shape[2])
    assert pe.shape[1] == D and pe.shape[0] >= S
    # D % 128 == 0 keeps stores lane-dense (unmasked vst); other D still works.
    # TODO(synk): pad d_model to a multiple of 128 upstream for full bandwidth.

    if tile_s is None:
        tile_s = _choose_tile_s(S, B, D, x.dtype.itemsize)
    tile_s = max(8, (tile_s // 8) * 8)  # keep the (8, 128) tiling rule satisfied

    grid = (pl.cdiv(S, tile_s),)

    block_bytes = tile_s * B * D * x.dtype.itemsize
    pe_bytes = tile_s * D * pe.dtype.itemsize
    # 2 x-bufs + 2 o-bufs + 2 pe-bufs + slack; at least 32 MiB (raises v5e's
    # 16 MiB default scoped limit; ~20 MiB actual usage fits v7x's 64 MiB).
    vmem_limit = int(max(32 << 20, 4 * block_bytes + 2 * pe_bytes + (2 << 20)))

    return pl.pallas_call(
        _pos_enc_kernel,
        out_shape=jax.ShapeDtypeStruct((S, B, D), x.dtype),
        grid=grid,
        in_specs=[
            # streaming (TILE_S, B, D) activation tiles
            pl.BlockSpec((tile_s, B, D), lambda i: (i, 0, 0)),
            # pe tile depends only on the S-tile index -> exactly one DMA per
            # tile; the pe[:seq_len] slice is expressed by the index_map.
            pl.BlockSpec((tile_s, D), lambda i: (i, 0)),
        ],
        out_specs=pl.BlockSpec((tile_s, B, D), lambda i: (i, 0, 0)),
        # in-place add when the caller donates x (halves HBM footprint;
        # XLA inserts a copy otherwise, so it is always safe).
        input_output_aliases={0: 0},
        compiler_params=pltpu.CompilerParams(
            dimension_semantics=("parallel",),   # shards S-tiles across v7x's 2 TCs
            vmem_limit_bytes=vmem_limit,
        ),
    )(x, pe)


# ----------------------- pe buffer (matches __init__) ----------------------
def make_positional_encoding(d_model, max_len):
    position = jnp.arange(max_len, dtype=jnp.float32)[:, None]           # (max_len, 1)
    div_term = jnp.exp(jnp.arange(0, d_model, 2, dtype=jnp.float32)
                       * (-math.log(10000.0) / d_model))                 # (d_model/2,)
    pe = jnp.zeros((max_len, 1, d_model), jnp.float32)
    pe = pe.at[:, 0, 0::2].set(jnp.sin(position * div_term))
    pe = pe.at[:, 0, 1::2].set(jnp.cos(position * div_term))
    return pe                                                            # (max_len, 1, d_model)


# --------------------------- pure-JAX reference -----------------------------
def reference_forward(x, pe):
    S = x.shape[0]
    return x + pe[:S]                   # dropout = identity (eval mode)


# ----------------------------------- main -----------------------------------
if __name__ == "__main__":
    key = jax.random.PRNGKey(0)

    S, B, D = 24, 2, 128     # seq_len, batch, d_model (D multiple of 128 -> lane-dense)
    MAX_LEN = 64             # max_len of the registered pe buffer (>= seq_len)

    x = jax.random.normal(key, (S, B, D), jnp.float32)
    pe = make_positional_encoding(D, MAX_LEN)

    # Reference computed before the (potentially in-place aliased) kernel call.
    ref = reference_forward(x, pe)

    # tile_s=8 forces a 3-step grid in this small demo so the tiled/pipelined
    # path is exercised; real shapes use the auto-chosen ~4 MiB tiles.
    out = positional_encoding_forward(x, pe, tile_s=8)
    out = jax.block_until_ready(out)

    assert out.shape == (S, B, D)
    assert jnp.allclose(out, ref, atol=1e-6, rtol=1e-6), "mismatch vs JAX reference"

    print("KERNEL_OK")
</pallas_src>

<mosaic_0001>
module attributes {stable_mosaic.version = 11 : i64} {
  func.func @_pos_enc_kernel(%arg0: i32, %arg1: memref<8x2x128xf32, #tpu.memory_space<vmem>>, %arg2: memref<8x128xf32, #tpu.memory_space<vmem>>, %arg3: memref<8x2x128xf32, #tpu.memory_space<vmem>>) attributes {dimension_semantics = [#tpu.dimension_semantics<parallel>], iteration_bounds = array<i64: 3>, scalar_prefetch = 0 : i64, scratch_operands = 0 : i64, tpu.core_type = #tpu.core_type<tc>, window_params = [{transform_indices = @transform_0, window_bounds = array<i64: 8, 2, 128>}, {transform_indices = @transform_1, window_bounds = array<i64: 8, 128>}, {transform_indices = @transform_2, window_bounds = array<i64: 8, 2, 128>}]} {
    %c0 = arith.constant 0 : index
    %c0_0 = arith.constant 0 : index
    %c0_1 = arith.constant 0 : index
    %0 = vector.load %arg1[%c0, %c0_0, %c0_1] : memref<8x2x128xf32, #tpu.memory_space<vmem>>, vector<8x2x128xf32>
    %c0_2 = arith.constant 0 : index
    %c0_3 = arith.constant 0 : index
    %1 = vector.load %arg2[%c0_2, %c0_3] : memref<8x128xf32, #tpu.memory_space<vmem>>, vector<8x128xf32>
    %2 = vector.shape_cast %1 : vector<8x128xf32> to vector<8x1x128xf32>
    %3 = vector.broadcast %2 : vector<8x1x128xf32> to vector<8x2x128xf32>
    %4 = arith.addf %0, %3 : vector<8x2x128xf32>
    %c0_4 = arith.constant 0 : index
    %c0_5 = arith.constant 0 : index
    %c0_6 = arith.constant 0 : index
    %5 = vector.load %arg3[%c0_4, %c0_5, %c0_6] : memref<8x2x128xf32, #tpu.memory_space<vmem>>, vector<8x2x128xf32>
    tpu.vector_store %arg3[%c0_4, %c0_5, %c0_6], %4 {strides = array<i32>} : memref<8x2x128xf32, #tpu.memory_space<vmem>>, vector<8x2x128xf32>,
    return
  }
  func.func @transform_0(%arg0: i32) -> (i32, i32, i32) {
    %c0_i32 = arith.constant 0 : i32
    %c0_i32_0 = arith.constant 0 : i32
    %c0_i32_1 = arith.constant 0 : i32
    return %arg0, %c0_i32, %c0_i32_0 : i32, i32, i32
  }
  func.func @transform_1(%arg0: i32) -> (i32, i32) {
    %c0_i32 = arith.constant 0 : i32
    %c0_i32_0 = arith.constant 0 : i32
    return %arg0, %c0_i32 : i32, i32
  }
  func.func @transform_2(%arg0: i32) -> (i32, i32, i32) {
    %c0_i32 = arith.constant 0 : i32
    %c0_i32_0 = arith.constant 0 : i32
    %c0_i32_1 = arith.constant 0 : i32
    return %arg0, %c0_i32, %c0_i32_0 : i32, i32, i32
  }
}

</mosaic_0001>

<bundles_post_ra>
// kernel: tpu_custom_call.1
= control target key start
LH: loop header
LB: loop body
LE: loop exit
PB: predicated region body
PF: predicated region fallthrough
CT: control target
= control target key end

     0   :  { %7 = vsyncpa [#allocation3], 0  ;;  %s661_s0 = inlined_call_operand.hbm [shape: f32[24,2,128], index: 0, kind: input, shape index: {}, may-alias: {0,2}]   ;;  %s662_s1 = inlined_call_operand.vmem [shape: f32[64,128], index: 1, kind: input, shape index: {}]   ;;  %s663_s2 = inlined_call_operand.hbm [shape: f32[24,2,128], index: 2, kind: output, shape index: {}, may-alias: {0,2}]  }
   0x1   :  { %9 = vsyncpa [#allocation3 + $0x1], 0 }
   0x2   :  { %10 = vsyncpa [#allocation4], 0 }
   0x3   :  { %12 = vsyncpa [#allocation4 + $0x1], 0  ;;  %s517_s9 = smov 0   ;;  %s519_s10 = smov 0  }
   0x4   :  { %s521_s11 = smov 0   ;;  %s523_s12 = smov 0  }
   0x5 LB: > { %s538_s13 = sadd.s32 4294967295, %s496_s12   ;;  %s333_s14 = sadd.s32 4294967294, %s496_s12   ;;  %s496_s12 = sphi %s523_s12, %s672_s12   ;;  %s492_s11 = sphi %s521_s11, %s671_s11   ;;  %s488_s10 = sphi %s519_s10, %s670_s10   ;;  %s484_s9 = sphi %s517_s9, %s669_s9  }
   0x6   : > { %s542_s15 = sadd.s32 1, %s496_s12   ;;  %s25_s16 = sadd.s32 1, %s492_s11 }
   0x7   : > { %s22_s17 = ssub.s32 %s496_s12, %s542_s15  ;;  %p32_p0 = scmp.ne.s32.totalorder %s492_s11, %s488_s10 }
   0x8   : > { %p23_p1 = scmp.eq.s32.totalorder %s22_s17, 0  ;;  %p33_p2 = scmp.eq.s32.totalorder %s496_s12, 0 }
   0x9   : > { %p38_p3 = scmp.ne.s32.totalorder %s488_s10, %s484_s9  ;;  %p39_p4 = scmp.eq.s32.totalorder %s538_s13, 0 }
   0xa   : > { %s554_s18 = scalar_select %p23_p1, %s492_s11, %s25_s16  }
   0xb   : > { %p556_p5 = por %p33_p2, %p32_p0  ;;  %p560_p6 = por %p39_p4, %p38_p3 }
   0xc   : > { %p88_p7 = scmp.eq.s32.totalorder %s538_s13, 2  ;;  %p94_p8 = scmp.eq.s32.totalorder %s333_s14, 2 }
   0xd   : > { %p362_p9 = scmp.lt.s32.totalorder %s496_s12, 3  ;;  %s114_s23 = sand.u32 1, %s492_s11  }
   0xe   : > { %p566_p10 = por %p88_p7, %p32_p0  ;;  %p570_p11 = por %p94_p8, %p38_p3 }
   0xf   : > { %s348_s24 = sshll.u32 %s496_s12, 4  ;;  %s336_s25 = sshll.u32 %s114_s23, 4 }
  0x10   : > { %s123_s28 = scalar_lea.hbm %s661_s0, %s348_s24  ;;  %s118_s30 = scalar_lea.vmem [#allocation2], %s336_s25 }
  0x11   : > { %s124_s29 = sshll.u32 %s123_s28, 4  ;;  %s126_s3 = sshll.u32 %s118_s30, 4  ;;  %s125_s29 = int_to_ptr.hbm [resolvable:$true] %s124_s29  ;;  %s127_s3 = int_to_ptr.vmem [resolvable:$true] %s126_s3 }
  0x12   : > { %p581_p12 = pnand %p362_p9, %p556_p5  ;;  %p339_p13 = scmp.ge.s32.totalorder %s496_s12, 1 }
  0x13   : > { %p141_p0 = scmp.lt.s32.totalorder %s496_s12, 4  ;;  %s115_s5 = scalar_lea.sflag [#allocation3], %s114_s23 }
  0x14   : > { %s400_s6 = sshra.s32 %s125_s29, 4  ;;  %p404_p2 = pneg %p581_p12  ;;  %s401_s6 = int_to_ptr.hbm [resolvable:$true] %s400_s6 }
  0x15   : > { %s402_s7 = scalar_lea.hbm %s401_s6, 16  ;;  %s407_s16 = scalar_lea.hbm %s661_s0, 48 }
  0x16   : > { %p403_p1 = scmp.ne.s32.totalorder %s401_s6, %s402_s7  ;;  %p408_p5 = scmp.lt.s32.totalorder %s401_s6, %s661_s0 }
  0x17   : > { %p409_p7 = scmp.lt.s32.totalorder %s407_s16, %s402_s7 }
  0x18   : > { %p405_p3 = pnand %p404_p2, %p403_p1 }
  0x19   : > { %p410_p8 = por %p409_p7, %p408_p5 }
  0x1a   : > { %p406_p4 = pneg %p405_p3 }
  0x1c   : > { %p411_p9 = pnand %p410_p8, %p406_p4 }
  0x1e   : > { %414 = shalt.err (!%p411_p9)
}
  0x1f   : > { %s498_s23 = smov 32   ;;  %s499_s24 = smov 2  }
  0x20   : > { %357 = dma.hbm_to_vmem [thread:$0]  (!%p581_p12), %s125_s29, 256, %s127_s3, %s115_s5, %s498_s23, %s498_s23, %s499_s24  }
  0x21   : > { %p142_p1 = pnand %p339_p13, %p141_p0 }
  0x22   : > { %s602_s25 = sand.u32 (!%p142_p1), 1, %s488_s10  }
  0x23   : > { %145 = sbr.rel (%p142_p1) target bundleno = 64 (0x40), region = 28  ;;  %s340_s26 = sshll.u32 (!%p142_p1), %s602_s25, 4 }
  0x24   : > { %s148_s27 = scalar_lea.sflag (!%p142_p1), [#allocation3], %s602_s25  ;;  %s608_s28 = scalar_lea.vmem (!%p142_p1), [#allocation2], %s340_s26 }
  0x28   : > { %475 = dma.done.wait (%p560_p6), %s148_s27, 256  }
  0x29   : > { %477 = vsyncadd (%p560_p6), %s148_s27, 4294967040  ;;  %p178_p12 = scmp.lt.s32.totalorder %s538_s13, 7  ;;  %v183_v0 = vld [vmem:[%s608_s28] sm:$0x3]  ;;  %s349_s6 = sshll.u32 %s538_s13, 4 }
  0x2a   : > { %v184_v3 = vld [vmem:[%s608_s28 + $0x2] sm:$0x3]  ;;  %v185_v7 = vld [vmem:[%s608_s28 + $0x4] sm:$0x3]  ;;  %v186_v8 = vld [vmem:[%s608_s28 + $0x6] sm:$0x3]  ;;  %s244_s7 = scalar_lea.hbm %s663_s2, %s349_s6 }
  0x2b   : > { %s179_s29 = scalar_select %p178_p12, %s538_s13, 7  ;;  %v187_v15 = vld [vmem:[%s608_s28 + $0x8] sm:$0x3]  ;;  %v188_v17 = vld [vmem:[%s608_s28 + $0xa] sm:$0x3] }
  0x2c   : > { %s176_s8 = scalar_lea.vmem [#allocation5], %s340_s26  ;;  %v189_v24 = vld [vmem:[%s608_s28 + $0xc] sm:$0x3]  ;;  %v190_v27 = vld [vmem:[%s608_s28 + $0xe] sm:$0x3]  ;;  %s247_s16 = sshll.u32 %s244_s7, 4  ;;  %s248_s16 = int_to_ptr.hbm [resolvable:$true] %s247_s16 }
  0x2d   : > { %s342_s30 = sshll.u32 %s179_s29, 3  ;;  %s245_s14 = sshll.u32 %s176_s8, 4  ;;  %s246_s14 = int_to_ptr.vmem [resolvable:$true] %s245_s14 }
  0x2e   : > { %s181_s5 = scalar_lea.vmem %s662_s1, %s342_s30  ;;  %s233_s17 = scalar_lea.sflag [#allocation4], %s602_s25 }
  0x2f   : > { %v191_v1 = vld [vmem:[%s181_s5] sm:$0xff]  ;;  %s444_s19 = sshra.s32 %s248_s16, 4  ;;  %s450_s27 = scalar_lea.hbm %s663_s2, 48  ;;  %s445_s19 = int_to_ptr.hbm [resolvable:$true] %s444_s19 }
  0x30   : > { %v200_v2 = vperm.slane %v191_v1, 0  ;;  %v193_v4 = vrot.slane %v191_v1, 1  ;;  %v194_v5 = vrot.slane %v191_v1, 2  ;;  %v195_v6 = vrot.slane %v191_v1, 3  ;;  %s446_s23 = scalar_lea.hbm %s445_s19, 16  ;;  %p451_p2 = scmp.lt.s32.totalorder %s445_s19, %s663_s2 }
  0x31   : > { %v196_v9 = vrot.slane %v191_v1, 4  ;;  %v197_v10 = vrot.slane %v191_v1, 5  ;;  %v198_v19 = vrot.slane %v191_v1, 6  ;;  %v199_v20 = vrot.slane %v191_v1, 7  ;;  %p447_p6 = scmp.ne.s32.totalorder %s445_s19, %s446_s23  ;;  %p452_p3 = scmp.lt.s32.totalorder %s450_s27, %s446_s23 }
  0x32   : > { %v216_v11 = vadd.f32 %v200_v2, %v183_v0  ;;  %v201_v12 = vperm.slane %v193_v4, 0  ;;  %v202_v13 = vperm.slane %v194_v5, 0  ;;  %v203_v14 = vperm.slane %v195_v6, 0 }
  0x33   : > { %v204_v16 = vperm.slane %v196_v9, 0  ;;  %v205_v18 = vperm.slane %v197_v10, 0  ;;  %v206_v26 = vperm.slane %v198_v19, 0  ;;  %v207_v28 = vperm.slane %v199_v20, 0  ;;  %p448_p13 = pnand %p447_p6, %p566_p10  ;;  %p453_p4 = por %p452_p3, %p451_p2 }
  0x34   : > { %224 = vst [vmem:[%s176_s8] sm:$0x3] %v216_v11  ;;  %v217_v21 = vadd.f32 %v201_v12, %v184_v3  ;;  %v218_v22 = vadd.f32 %v202_v13, %v185_v7  ;;  %v219_v23 = vadd.f32 %v203_v14, %v186_v8 }
  0x35   : > { %v220_v25 = vadd.f32 %v204_v16, %v187_v15  ;;  %v221_v29 = vadd.f32 %v205_v18, %v188_v17  ;;  %v222_v30 = vadd.f32 %v206_v26, %v189_v24  ;;  %v223_v31 = vadd.f32 %v207_v28, %v190_v27  ;;  %p449_p0 = pneg %p448_p13 }
  0x36   : > { %225 = vst [vmem:[%s176_s8 + $0x2] sm:$0x3] %v217_v21 }
  0x37   : > { %226 = vst [vmem:[%s176_s8 + $0x4] sm:$0x3] %v218_v22  ;;  %p454_p5 = pnand %p453_p4, %p449_p0 }
  0x38   : > { %227 = vst [vmem:[%s176_s8 + $0x6] sm:$0x3] %v219_v23 }
  0x39   : > { %228 = vst [vmem:[%s176_s8 + $0x8] sm:$0x3] %v220_v25 }
  0x3a   : > { %229 = vst [vmem:[%s176_s8 + $0xa] sm:$0x3] %v221_v29 }
  0x3b   : > { %230 = vst [vmem:[%s176_s8 + $0xc] sm:$0x3] %v222_v30 }
  0x3c   : > { %231 = vst [vmem:[%s176_s8 + $0xe] sm:$0x3] %v223_v31 }
  0x3d   : > { %457 = shalt.err (!%p454_p5)
}
  0x3e   : > { %s500_s25 = smov 32   ;;  %s501_s30 = smov 2  }
  0x3f   : > { %352 = dma.vmem_to_hbm [thread:$0]  (%p566_p10), %s246_s14, 256, %s248_s16, %s233_s17, %s500_s25, %s500_s25, %s501_s30  }
  0x40 PF: > { %p363_p7 = scmp.ge.s32.totalorder %s496_s12, 2  ;;  %s262_s3 = sand.u32 1, %s484_s9  }
  0x41   : > { %s263_s4 = scalar_lea.sflag [#allocation4], %s262_s3 }
  0x42   : > { %p359_p8 = pnand %p363_p7, %p570_p11 }
  0x44   : > { %p360_p9 = pneg %p359_p8 }
  0x46   : > { %479 = dma.done.wait (%p360_p9), %s263_s4, 256  }
  0x47   : > { %481 = vsyncadd (%p360_p9), %s263_s4, 4294967040  ;;  %p15_p1 = scmp.ge.s32.totalorder %s542_s15, 5   ;;  %s669_s9 = smov %s488_s10 }
  0x48   : > { %s670_s10 = smov %s492_s11  ;;  %s671_s11 = smov %s554_s18 }
  0x49   : > { %s672_s12 = smov %s542_s15  ;;  %17 = sbr.rel (!%p15_p1) target bundleno = 5 (0x5), region = 76 }
  0x4e   :  { %269 = vsyncpa [#allocation3], 1 }
  0x4f   :  { %271 = vsyncpa [#allocation3 + $0x1], 1 }
  0x50   :  { %272 = vsyncpa [#allocation4], 1 }
  0x51   :  { %274 = vsyncpa [#allocation4 + $0x1], 1 }

</bundles_post_ra>
